<compile_context>
chip_gen: v7x
topology: tpu7x:2x2x1
jax: 0.10.0
libtpu: 0.0.40
codegen_flags: <defaults>
</compile_context>

<pallas_src>
import jax
import jax.numpy as jnp
from jax.experimental import pallas as pl
from jax.experimental.pallas import tpu as pltpu

LANE = 128  # padding target for the VMEM-resident hidden dimension


def _round_up(x, m):
    return ((x + m - 1) // m) * m


def _choose_batch_tiling(B):
    """Pick (TB, Bp, n_tiles): TB multiple of 8, minimal batch padding,
    >=2 tiles when the batch is big enough (keeps both v7x TCs busy)."""
    TB_CAP = 1024
    b8 = _round_up(max(B, 1), 8)
    if b8 <= TB_CAP:
        if b8 >= 16 and (b8 // 2) % 8 == 0:
            tb = b8 // 2          # two equal tiles, zero extra padding
        else:
            tb = b8               # single tile
    else:
        n_tiles = pl.cdiv(b8, TB_CAP)
        if n_tiles % 2:
            n_tiles += 1          # even tile count for v7x megacore
        tb = _round_up(pl.cdiv(b8, n_tiles), 8)
    n_tiles = pl.cdiv(b8, tb)
    return tb, tb * n_tiles, n_tiles


def pg_network_kernel(x_ref, w1_ref, b1_ref, w2_ref, b2_ref, out_ref):
    # fc1: x @ w1 + b1, ReLU.  x is (TB, n_state) unpadded; w1 is (n_state, HP).
    h = jnp.dot(x_ref[...], w1_ref[...], preferred_element_type=jnp.float32)
    h = jnp.maximum(h + b1_ref[...], 0.0)           # (TB,HP) + (1,HP) broadcast
    # fc2: h @ w2 + b2  ->  (TB, n_action) written directly (no lane padding).
    o = jnp.dot(h, w2_ref[...], preferred_element_type=jnp.float32)
    out_ref[...] = (o + b2_ref[...]).astype(out_ref.dtype)


def prepare_params(w1, b1, w2, b2):
    """One-time padding of the VMEM-resident params (hidden dim -> 128).

    w1: (n_state, hidden), b1: (hidden,), w2: (hidden, n_action), b2: (n_action,)
    Padded hidden units have zero weights/bias, so ReLU(0)=0 and the zero rows
    of w2 guarantee no leakage into real outputs.
    """
    n_state, hidden = w1.shape
    n_action = w2.shape[1]
    hp = _round_up(max(hidden, 1), LANE)
    w1_p = jnp.zeros((n_state, hp), jnp.float32).at[:, :hidden].set(w1)
    b1_p = jnp.zeros((1, hp), jnp.float32).at[0, :hidden].set(b1)
    w2_p = jnp.zeros((hp, n_action), jnp.float32).at[:hidden, :].set(w2)
    b2_p = jnp.reshape(b2.astype(jnp.float32), (1, n_action))
    return w1_p, b1_p, w2_p, b2_p


def pg_network_forward(x, w1_p, b1_p, w2_p, b2_p):
    """Fused PGNetwork forward with pre-padded params (see prepare_params).

    x: (B, n_state) f32  ->  (B, n_action) f32 logits (no softmax).
    """
    B, n_state = x.shape
    hp = w1_p.shape[1]
    n_action = w2_p.shape[1]

    TB, Bp, n_tiles = _choose_batch_tiling(B)
    x_p = x if Bp == B else jnp.pad(x, ((0, Bp - B), (0, 0)))

    out_p = pl.pallas_call(
        pg_network_kernel,
        out_shape=jax.ShapeDtypeStruct((Bp, n_action), jnp.float32),
        grid=(n_tiles,),
        in_specs=[
            pl.BlockSpec((TB, n_state), lambda i: (i, 0)),   # x: streamed, unpadded
            pl.BlockSpec((n_state, hp), lambda i: (0, 0)),   # w1: VMEM-resident
            pl.BlockSpec((1, hp), lambda i: (0, 0)),         # b1: VMEM-resident
            pl.BlockSpec((hp, n_action), lambda i: (0, 0)),  # w2: VMEM-resident
            pl.BlockSpec((1, n_action), lambda i: (0, 0)),   # b2: VMEM-resident
        ],
        out_specs=pl.BlockSpec((TB, n_action), lambda i: (i, 0)),
        compiler_params=pltpu.CompilerParams(
            dimension_semantics=("parallel",),               # both TCs on v7x
        ),
    )(x_p, w1_p, b1_p, w2_p, b2_p)

    return out_p if Bp == B else out_p[:B]


def init_params(key, n_state, n_action, hidden=20):
    """Init matching the PyTorch module: weights ~ N(0, 0.1); biases use
    nn.Linear's default U(-1/sqrt(fan_in), 1/sqrt(fan_in)).  Weights are
    stored transposed so the kernel computes x @ w."""
    k1, k2, k3, k4 = jax.random.split(key, 4)
    w1 = 0.1 * jax.random.normal(k1, (n_state, hidden), dtype=jnp.float32)
    w2 = 0.1 * jax.random.normal(k2, (hidden, n_action), dtype=jnp.float32)
    bound1 = 1.0 / (n_state ** 0.5)
    bound2 = 1.0 / (hidden ** 0.5)
    b1 = jax.random.uniform(k3, (hidden,), jnp.float32, -bound1, bound1)
    b2 = jax.random.uniform(k4, (n_action,), jnp.float32, -bound2, bound2)
    return w1, b1, w2, b2


def _reference(x, w1, b1, w2, b2):
    return jnp.maximum(x @ w1 + b1[None, :], 0.0) @ w2 + b2[None, :]


if __name__ == "__main__":
    key = jax.random.PRNGKey(0)
    n_state, n_action = 4, 2
    kx, kx2, kp = jax.random.split(key, 3)
    w1, b1, w2, b2 = init_params(kp, n_state, n_action)

    # One-time param padding (hoisted out of the per-call forward path).
    w1_p, b1_p, w2_p, b2_p = prepare_params(w1, b1, w2, b2)
    fwd = jax.jit(pg_network_forward)

    # Small batch (single grid step, no batch padding).
    B = 8
    x = jax.random.normal(kx, (B, n_state), dtype=jnp.float32)
    out = jax.block_until_ready(fwd(x, w1_p, b1_p, w2_p, b2_p))
    ref = _reference(x, w1, b1, w2, b2)
    assert out.shape == (B, n_action)
    assert jnp.allclose(out, ref, atol=1e-5, rtol=1e-5)

    # Larger batch: exercises batch padding (300 -> 304) and 2 grid tiles.
    B2 = 300
    x2 = jax.random.normal(kx2, (B2, n_state), dtype=jnp.float32)
    out2 = jax.block_until_ready(fwd(x2, w1_p, b1_p, w2_p, b2_p))
    ref2 = _reference(x2, w1, b1, w2, b2)
    assert out2.shape == (B2, n_action)
    assert jnp.allclose(out2, ref2, atol=1e-5, rtol=1e-5)

    print("KERNEL_OK")
</pallas_src>

<mosaic_0001>
module attributes {stable_mosaic.version = 11 : i64} {
  func.func @pg_network_kernel(%arg0: i32, %arg1: memref<8x4xf32, #tpu.memory_space<vmem>>, %arg2: memref<4x128xf32, #tpu.memory_space<vmem>>, %arg3: memref<1x128xf32, #tpu.memory_space<vmem>>, %arg4: memref<128x2xf32, #tpu.memory_space<vmem>>, %arg5: memref<1x2xf32, #tpu.memory_space<vmem>>, %arg6: memref<8x2xf32, #tpu.memory_space<vmem>>) attributes {dimension_semantics = [#tpu.dimension_semantics<parallel>], iteration_bounds = array<i64: 1>, scalar_prefetch = 0 : i64, scratch_operands = 0 : i64, tpu.core_type = #tpu.core_type<tc>, window_params = [{transform_indices = @transform_0, window_bounds = array<i64: 8, 4>}, {pipeline_mode = #tpu.pipeline_mode<synchronous>, transform_indices = @transform_1, window_bounds = array<i64: 4, 128>}, {pipeline_mode = #tpu.pipeline_mode<synchronous>, transform_indices = @transform_2, window_bounds = array<i64: 1, 128>}, {pipeline_mode = #tpu.pipeline_mode<synchronous>, transform_indices = @transform_3, window_bounds = array<i64: 128, 2>}, {pipeline_mode = #tpu.pipeline_mode<synchronous>, transform_indices = @transform_4, window_bounds = array<i64: 1, 2>}, {transform_indices = @transform_5, window_bounds = array<i64: 8, 2>}]} {
    %c0 = arith.constant 0 : index
    %c0_0 = arith.constant 0 : index
    %0 = vector.load %arg1[%c0, %c0_0] : memref<8x4xf32, #tpu.memory_space<vmem>>, vector<8x4xf32>
    %c0_1 = arith.constant 0 : index
    %c0_2 = arith.constant 0 : index
    %1 = vector.load %arg2[%c0_1, %c0_2] : memref<4x128xf32, #tpu.memory_space<vmem>>, vector<4x128xf32>
    %cst = arith.constant dense<0.000000e+00> : vector<8x128xf32>
    %2 = tpu.matmul %0, %1, %cst {dimension_numbers = #tpu.dot_dimension_numbers<[1], [0], [0], [1], [0, 0, 1, 1], [], []>} : vector<8x4xf32>, vector<4x128xf32>, vector<8x128xf32> -> vector<8x128xf32>
    %c0_3 = arith.constant 0 : index
    %c0_4 = arith.constant 0 : index
    %3 = vector.load %arg3[%c0_3, %c0_4] : memref<1x128xf32, #tpu.memory_space<vmem>>, vector<1x128xf32>
    %4 = vector.broadcast %3 : vector<1x128xf32> to vector<8x128xf32>
    %5 = arith.addf %2, %4 : vector<8x128xf32>
    %cst_5 = arith.constant 0.000000e+00 : f32
    %6 = vector.broadcast %cst_5 : f32 to vector<8x128xf32>
    %7 = arith.maximumf %5, %6 : vector<8x128xf32>
    %c0_6 = arith.constant 0 : index
    %c0_7 = arith.constant 0 : index
    %8 = vector.load %arg4[%c0_6, %c0_7] : memref<128x2xf32, #tpu.memory_space<vmem>>, vector<128x2xf32>
    %cst_8 = arith.constant dense<0.000000e+00> : vector<8x2xf32>
    %9 = tpu.matmul %7, %8, %cst_8 {dimension_numbers = #tpu.dot_dimension_numbers<[1], [0], [0], [1], [0, 0, 1, 1], [], []>} : vector<8x128xf32>, vector<128x2xf32>, vector<8x2xf32> -> vector<8x2xf32>
    %c0_9 = arith.constant 0 : index
    %c0_10 = arith.constant 0 : index
    %10 = vector.load %arg5[%c0_9, %c0_10] : memref<1x2xf32, #tpu.memory_space<vmem>>, vector<1x2xf32>
    %11 = vector.broadcast %10 : vector<1x2xf32> to vector<8x2xf32>
    %12 = arith.addf %9, %11 : vector<8x2xf32>
    %c0_11 = arith.constant 0 : index
    %c0_12 = arith.constant 0 : index
    %13 = vector.load %arg6[%c0_11, %c0_12] : memref<8x2xf32, #tpu.memory_space<vmem>>, vector<8x2xf32>
    tpu.vector_store %arg6[%c0_11, %c0_12], %12 {strides = array<i32>} : memref<8x2xf32, #tpu.memory_space<vmem>>, vector<8x2xf32>,
    return
  }
  func.func @transform_0(%arg0: i32) -> (i32, i32) {
    %c0_i32 = arith.constant 0 : i32
    %c0_i32_0 = arith.constant 0 : i32
    return %arg0, %c0_i32 : i32, i32
  }
  func.func @transform_1(%arg0: i32) -> (i32, i32) {
    %c0_i32 = arith.constant 0 : i32
    %c0_i32_0 = arith.constant 0 : i32
    %c0_i32_1 = arith.constant 0 : i32
    return %c0_i32, %c0_i32_0 : i32, i32
  }
  func.func @transform_2(%arg0: i32) -> (i32, i32) {
    %c0_i32 = arith.constant 0 : i32
    %c0_i32_0 = arith.constant 0 : i32
    %c0_i32_1 = arith.constant 0 : i32
    return %c0_i32, %c0_i32_0 : i32, i32
  }
  func.func @transform_3(%arg0: i32) -> (i32, i32) {
    %c0_i32 = arith.constant 0 : i32
    %c0_i32_0 = arith.constant 0 : i32
    %c0_i32_1 = arith.constant 0 : i32
    return %c0_i32, %c0_i32_0 : i32, i32
  }
  func.func @transform_4(%arg0: i32) -> (i32, i32) {
    %c0_i32 = arith.constant 0 : i32
    %c0_i32_0 = arith.constant 0 : i32
    %c0_i32_1 = arith.constant 0 : i32
    return %c0_i32, %c0_i32_0 : i32, i32
  }
  func.func @transform_5(%arg0: i32) -> (i32, i32) {
    %c0_i32 = arith.constant 0 : i32
    %c0_i32_0 = arith.constant 0 : i32
    return %arg0, %c0_i32 : i32, i32
  }
}

</mosaic_0001>

<bundles_post_ra>
// kernel: pg_network_forward.1
= control target key start
LH: loop header
LB: loop body
LE: loop exit
PB: predicated region body
PF: predicated region fallthrough
CT: control target
= control target key end

     0   :  { %vm33_vm0 = vcmask 1043456   ;;  %vm29_vm1 = vcmask 31744   ;;  %v297_v0 = vmov 0.0   ;;  %vm298_vm2 = vmmov 0   ;;  %s393_s1 = inlined_call_operand.vmem [shape: f32[4,128], index: 1, kind: input, shape index: {}]   ;;  %s394_s0 = inlined_call_operand.vmem [shape: f32[8,4], index: 0, kind: input, shape index: {}]   ;;  %s395_s3 = inlined_call_operand.vmem [shape: f32[128,2], index: 3, kind: input, shape index: {}]   ;;  %s396_s2 = inlined_call_operand.vmem [shape: f32[1,128], index: 2, kind: input, shape index: {}]   ;;  %s397_s4 = inlined_call_operand.vmem [shape: f32[1,2], index: 4, kind: input, shape index: {}]   ;;  %s398_s5 = inlined_call_operand.vmem [shape: f32[8,2], index: 5, kind: output, shape index: {}]  }
   0x1   :  { %230 = vmatprep.subr.mxu0 %v297_v0  ;;  %v21_v1 = vld [vmem:[%s393_s1] sm:$0xf]  ;;  %232 = vmatprep.mubr.msk.f32.mxu0 %vm298_vm2, %v297_v0  ;;  %v299_v4 = vmov 0.0|0.0   ;;  %v109_v5 = vld [vmem:[%s395_s3 + $0x8] sm:$0xff]  ;;  %v110_v6 = vld [vmem:[%s395_s3 + $0x10] sm:$0xff]  ;;  %vm201_vm3 = vcmask 15360  }
   0x2   :  { %v20_v2 = vld [vmem:[%s394_s0] sm:$0xff]  ;;  %231 = vmatpush3.msk.msra.mxu0 %vm33_vm0, %v21_v1  ;;  %270 = vmatprep.subr.bf16.mxu1 %v299_v4  ;;  %v111_v7 = vld [vmem:[%s395_s3 + $0x18] sm:$0xff]  ;;  %v113_v11 = vld [vmem:[%s395_s3 + $0x28] sm:$0xff] }
   0x3   :  { %v108_v3 = vld [vmem:[%s395_s3] sm:$0xff]  ;;  %233 = vmatmul.mubr.msk.f32.vlgmr.msra.gmra.mrb[0].mxu0 %vm29_vm1, %v20_v2  ;;  %267 = vmatprep.mubr.msk.f32.mxu1 %vm298_vm2, %v297_v0  ;;  %v274_v9 = vpack.c.bf16 %v111_v7, %v110_v6  ;;  %v114_v13 = vld [vmem:[%s395_s3 + $0x30] sm:$0xff]  ;;  %v115_v14 = vld [vmem:[%s395_s3 + $0x38] sm:$0xff] }
   0x4   :  { %v271_v8 = vpack.c.bf16 %v109_v5, %v108_v3  ;;  %v112_v10 = vld [vmem:[%s395_s3 + $0x20] sm:$0xff]  ;;  %v280_v15 = vpack.c.bf16 %v115_v14, %v114_v13  ;;  %v117_v17 = vld [vmem:[%s395_s3 + $0x48] sm:$0xff]  ;;  %v118_v19 = vld [vmem:[%s395_s3 + $0x50] sm:$0xff] }
   0x5   :  { %v277_v12 = vpack.c.bf16 %v113_v11, %v112_v10  ;;  %v116_v16 = vld [vmem:[%s395_s3 + $0x40] sm:$0xff]  ;;  %v119_v20 = vld [vmem:[%s395_s3 + $0x58] sm:$0xff]  ;;  %v121_v23 = vld [vmem:[%s395_s3 + $0x68] sm:$0xff] }
   0x6   :  { %272 = vmatpush3.bf16.msra.mxu1 %v271_v8  ;;  %v283_v18 = vpack.c.bf16 %v117_v17, %v116_v16  ;;  %v286_v21 = vpack.c.bf16 %v119_v20, %v118_v19  ;;  %v120_v22 = vld [vmem:[%s395_s3 + $0x60] sm:$0xff]  ;;  %v122_v25 = vld [vmem:[%s395_s3 + $0x70] sm:$0xff]  ;;  %v123_v26 = vld [vmem:[%s395_s3 + $0x78] sm:$0xff] }
   0x7   :  { %273 = vmatprep.subr.bf16.mxu1 %v299_v4  ;;  %v289_v24 = vpack.c.bf16 %v121_v23, %v120_v22  ;;  %v292_v27 = vpack.c.bf16 %v123_v26, %v122_v25  ;;  %v207_v28 = vld [vmem:[%s396_s2] ss:$0 sm:$0xff] }
   0x8   :  { %v210_v33 = vld [vmem:[%s397_s4] ss:$0 sm:$0xff] }
   0xa   :  { %275 = vmatpush3.bf16.msra.mxu1 %v274_v9 }
   0xb   :  { %276 = vmatprep.subr.bf16.mxu1 %v299_v4 }
   0xe   :  { %278 = vmatpush3.bf16.msra.mxu1 %v277_v12 }
   0xf   :  { %279 = vmatprep.subr.bf16.mxu1 %v299_v4 }
  0x12   :  { %281 = vmatpush3.bf16.msra.mxu1 %v280_v15 }
  0x13   :  { %282 = vmatprep.subr.bf16.mxu1 %v299_v4 }
  0x16   :  { %284 = vmatpush3.bf16.msra.mxu1 %v283_v18 }
  0x17   :  { %285 = vmatprep.subr.bf16.mxu1 %v299_v4 }
  0x1a   :  { %287 = vmatpush3.bf16.msra.mxu1 %v286_v21 }
  0x1b   :  { %288 = vmatprep.subr.bf16.mxu1 %v299_v4 }
  0x1e   :  { %290 = vmatpush3.bf16.msra.mxu1 %v289_v24 }
  0x1f   :  { %291 = vmatprep.subr.bf16.mxu1 %v299_v4 }
  0x22   :  { %293 = vmatpush3.bf16.msra.mxu1 %v292_v27 }
  0xd6   :  { %v103_v29 = vpop.f32.mrb[0].mxu0 }
  0xd7   :  { %v104_v30 = vadd.f32 %v207_v28, %v103_v29  ;;  %v234_v31 = vpop.f32.mrb[1].mxu0 }
  0xd9   :  { %v107_v32 = vmax.f32 %v104_v30, 0.0 }
  0xdb   :  { %268 = vmatmul.mubr.f32.vlgmr.msra.gmra.mrb[0].mxu1 %v107_v32 }
 0x1ae   :  { %v197_v34 = vpop.f32.mrb[0].mxu1 }
 0x1af   :  { %v198_v35 = vadd.f32 %v210_v33, %v197_v34  ;;  %v269_v36 = vpop.f32.mrb[1].mxu1 }
 0x1b1   :  { %202 = vst.msk [vmem:[%s398_s5] sm:$0xff] %vm201_vm3, %v198_v35 }

</bundles_post_ra>
